<compile_context>
chip_gen: v5e
topology: v5e:2x2
jax: 0.10.0
libtpu: 0.0.40
codegen_flags: <defaults>
</compile_context>

<pallas_src>
import jax
import jax.numpy as jnp
from jax.experimental import pallas as pl
from jax.experimental.pallas import tpu as pltpu


def _round_up(x, m):
    return ((x + m - 1) // m) * m


def _round_down(x, m):
    return (x // m) * m


def _line_transform_kernel(x_ref, wb_ref, o_ref):
    # Hot path: 2 vmul + 2 vadd per output vreg on the VPU, hidden under the store
    # stream (kernel is HBM-writeback bound).
    x = x_ref[...]                      # [TILE_N, 2]
    w0 = wb_ref[0:1, :]                 # [1, TILE_D]  (resident along the N axis)
    w1 = wb_ref[1:2, :]
    b = wb_ref[2:3, :]
    y = x[:, 0:1] * w0 + x[:, 1:2] * w1 + b
    o_ref[...] = y.astype(o_ref.dtype)


def line_transform(x, weight, bias, *, target_block_bytes=2 << 20):
    """
    x:      [N, 2]            float32
    weight: [output_dim, 2]   (PyTorch nn.Linear layout)
    bias:   [output_dim]
    returns [N, output_dim]   == x @ weight.T + bias
    """
    N = x.shape[0]
    D = weight.shape[0]
    out_dtype = x.dtype
    itemsize = jnp.dtype(out_dtype).itemsize

    # Fused resident operand: rows 0,1 = W^T, row 2 = bias.  (3, D) sublane-pads to 8.
    wb = jnp.concatenate(
        [weight.T.astype(out_dtype), bias.reshape(1, D).astype(out_dtype)], axis=0
    )  # [3, D]

    # ---- D (lane) tiling: full D if modest, else a multiple-of-128 tile (ragged last
    # block handled by masked stores).
    tile_d = D if D <= 2048 else 2048
    grid_d = pl.cdiv(D, tile_d)

    # ---- N (sublane) tiling: size the output block to ~target_block_bytes, capped at
    # round_up(ceil(N/2), 8) so there are always >=2 grid steps when N >= 16
    # (dual-TensorCore sharding on v7x; free on v5e/v6e).
    if N < 16:
        tile_n = N                       # full-dim block is always legal
    else:
        rows = max(8, target_block_bytes // (tile_d * itemsize))
        tile_n = max(8, _round_down(rows, 8))
        half = _round_up(-(-N // 2), 8)  # round_up(ceil(N/2), 8) < N for N >= 16
        tile_n = min(tile_n, half)
    grid_n = pl.cdiv(N, tile_n)

    # Double-buffered VMEM working set: out block + lane-padded x block (2 -> 128
    # lanes) + sublane-padded wb block (3 -> 8). 2x headroom, capped under v7x's
    # 64 MiB physical VMEM (and well under v5e/v6e's 128 MiB).
    # TODO(synk): for very large N on v7x, a lane-dense x layout ((2, N) blocks +
    # in-kernel XLU transpose) would reclaim the lane-padding VMEM; skipped for
    # simplicity since the current working set is already small.
    vmem_need = 2 * (
        tile_n * tile_d * itemsize
        + tile_n * 128 * itemsize
        + 8 * tile_d * itemsize
    )
    vmem_limit = int(min(max(2 * vmem_need, 16 << 20), 48 << 20))

    cost = pl.CostEstimate(
        flops=4 * N * D,
        transcendentals=0,
        bytes_accessed=(N * D + 2 * N + 3 * D) * itemsize,
    )

    return pl.pallas_call(
        _line_transform_kernel,
        out_shape=jax.ShapeDtypeStruct((N, D), out_dtype),
        grid_spec=pl.GridSpec(
            grid=(grid_n, grid_d),
            in_specs=[
                pl.BlockSpec((tile_n, 2), lambda i, j: (i, 0)),
                pl.BlockSpec((3, tile_d), lambda i, j: (0, j)),
            ],
            out_specs=pl.BlockSpec((tile_n, tile_d), lambda i, j: (i, j)),
        ),
        compiler_params=pltpu.CompilerParams(
            dimension_semantics=("parallel", "parallel"),
            vmem_limit_bytes=vmem_limit,
        ),
        cost_estimate=cost,
    )(x, wb)


if __name__ == "__main__":
    key = jax.random.PRNGKey(0)
    cases = [
        (200, 128),  # ragged N (2 grid steps along N), lane-dense D
        (8, 32),     # original tiny nn.Linear(2, 32) shape, single block
        (40, 300),   # D not a multiple of 128 (full-dim lane block), ragged N tile
    ]
    for idx, (n, d) in enumerate(cases):
        kx, kw, kb, key = jax.random.split(key, 4)
        x = jax.random.normal(kx, (n, 2), dtype=jnp.float32)
        w = jax.random.normal(kw, (d, 2), dtype=jnp.float32) * 0.5
        b = jax.random.normal(kb, (d,), dtype=jnp.float32) * 0.1
        out = jax.block_until_ready(line_transform(x, w, b))
        ref = x @ w.T + b
        assert out.shape == (n, d), (out.shape, (n, d))
        assert jnp.allclose(out, ref, atol=1e-5, rtol=1e-5), f"mismatch on case {idx}"
    print("KERNEL_OK")
</pallas_src>

<mosaic_0001>
module attributes {stable_mosaic.version = 11 : i64} {
  func.func @_line_transform_kernel(%arg0: i32, %arg1: i32, %arg2: memref<104x2xf32, #tpu.memory_space<vmem>>, %arg3: memref<3x128xf32, #tpu.memory_space<vmem>>, %arg4: memref<104x128xf32, #tpu.memory_space<vmem>>) attributes {dimension_semantics = [#tpu.dimension_semantics<parallel>, #tpu.dimension_semantics<parallel>], iteration_bounds = array<i64: 2, 1>, scalar_prefetch = 0 : i64, scratch_operands = 0 : i64, tpu.core_type = #tpu.core_type<tc>, window_params = [{transform_indices = @transform_0, window_bounds = array<i64: 104, 2>}, {transform_indices = @transform_1, window_bounds = array<i64: 3, 128>}, {transform_indices = @transform_2, window_bounds = array<i64: 104, 128>}]} {
    %c0 = arith.constant 0 : index
    %c0_0 = arith.constant 0 : index
    %0 = vector.load %arg2[%c0, %c0_0] : memref<104x2xf32, #tpu.memory_space<vmem>>, vector<104x2xf32>
    %c0_1 = arith.constant 0 : index
    %c0_2 = arith.constant 0 : index
    %1 = vector.load %arg3[%c0_1, %c0_2] : memref<3x128xf32, #tpu.memory_space<vmem>>, vector<1x128xf32>
    %c1 = arith.constant 1 : index
    %c0_3 = arith.constant 0 : index
    %2 = vector.load %arg3[%c1, %c0_3] : memref<3x128xf32, #tpu.memory_space<vmem>>, vector<1x128xf32>
    %c2 = arith.constant 2 : index
    %c0_4 = arith.constant 0 : index
    %3 = vector.load %arg3[%c2, %c0_4] : memref<3x128xf32, #tpu.memory_space<vmem>>, vector<1x128xf32>
    %4 = vector.extract_strided_slice %0 {offsets = [0, 0], sizes = [104, 1], strides = [1, 1]} : vector<104x2xf32> to vector<104x1xf32>
    %5 = vector.broadcast %4 : vector<104x1xf32> to vector<104x128xf32>
    %6 = vector.broadcast %1 : vector<1x128xf32> to vector<104x128xf32>
    %7 = arith.mulf %5, %6 : vector<104x128xf32>
    %8 = vector.extract_strided_slice %0 {offsets = [0, 1], sizes = [104, 1], strides = [1, 1]} : vector<104x2xf32> to vector<104x1xf32>
    %9 = vector.broadcast %8 : vector<104x1xf32> to vector<104x128xf32>
    %10 = vector.broadcast %2 : vector<1x128xf32> to vector<104x128xf32>
    %11 = arith.mulf %9, %10 : vector<104x128xf32>
    %12 = arith.addf %7, %11 : vector<104x128xf32>
    %13 = vector.broadcast %3 : vector<1x128xf32> to vector<104x128xf32>
    %14 = arith.addf %12, %13 : vector<104x128xf32>
    %c0_5 = arith.constant 0 : index
    %c0_6 = arith.constant 0 : index
    %15 = vector.load %arg4[%c0_5, %c0_6] : memref<104x128xf32, #tpu.memory_space<vmem>>, vector<104x128xf32>
    tpu.vector_store %arg4[%c0_5, %c0_6], %14 {strides = array<i32>} : memref<104x128xf32, #tpu.memory_space<vmem>>, vector<104x128xf32>,
    return
  }
  func.func @transform_0(%arg0: i32, %arg1: i32) -> (i32, i32) {
    %c0_i32 = arith.constant 0 : i32
    %c0_i32_0 = arith.constant 0 : i32
    return %arg0, %c0_i32 : i32, i32
  }
  func.func @transform_1(%arg0: i32, %arg1: i32) -> (i32, i32) {
    %c0_i32 = arith.constant 0 : i32
    %c0_i32_0 = arith.constant 0 : i32
    return %c0_i32, %arg1 : i32, i32
  }
  func.func @transform_2(%arg0: i32, %arg1: i32) -> (i32, i32) {
    %c0_i32 = arith.constant 0 : i32
    return %arg0, %arg1 : i32, i32
  }
}

</mosaic_0001>

<bundles_post_ra>
// kernel: tpu_custom_call.1
= control target key start
LH: loop header
LB: loop body
LE: loop exit
PB: predicated region body
PF: predicated region fallthrough
CT: control target
= control target key end

     0   :  { %7 = vsyncpa [#allocation3], 0  ;;  %s918_s0 = inlined_call_operand.vmem [shape: f32[200,2], index: 0, kind: input, shape index: {}]   ;;  %s919_s1 = inlined_call_operand.vmem [shape: f32[3,128], index: 1, kind: input, shape index: {}]   ;;  %s920_s2 = inlined_call_operand.hbm [shape: f32[200,128], index: 2, kind: output, shape index: {}]  }
   0x1   :  { %9 = vsyncpa [#allocation3 + $0x1], 0  ;;  %s706_s9 = smov 0   ;;  %s708_s10 = smov 0  }
   0x2   :  { %s710_s11 = smov 0   ;;  %s712_s12 = smov 0  }
   0x3   :  { %s714_s13 = smov 0   ;;  %s716_s14 = smov 0  }
   0x4 LB: > { %s512_s15 = sadd.s32 4294967295, %s684_s14   ;;  %s513_s16 = sadd.s32 4294967294, %s684_s14   ;;  %s684_s14 = sphi %s716_s14, %s15_s14   ;;  %s680_s13 = sphi %s714_s13, %s928_s13   ;;  %s676_s12 = sphi %s712_s12, %s927_s12   ;;  %s672_s11 = sphi %s710_s11, %s926_s11   ;;  %s668_s10 = sphi %s708_s10, %s925_s10   ;;  %s664_s9 = sphi %s706_s9, %s924_s9  }
   0x5   : > { %s27_s17 = sadd.s32 1, %s680_s13  ;;  %s88_s18 = sadd.s32 1, %s672_s11 }
   0x6   : > { %p29_p0 = scmp.ge.s32.totalorder %s27_s17, 2  ;;  %p98_p1 = scmp.ne.s32.totalorder %s672_s11, %s668_s10 }
   0x7   : > { %p99_p2 = scmp.eq.s32.totalorder %s512_s15, 1  ;;  %p104_p3 = scmp.ne.s32.totalorder %s668_s10, %s664_s9 }
   0x8   : > { %s930_s17 = smov (%p29_p0, %s27_s17), 0  ;;  %p105_p5 = scmp.eq.s32.totalorder %s513_s16, 1 }
   0x9   : > { %p746_p4 = por %p99_p2, %p98_p1  ;;  %s83_s20 = ssub.s32 %s680_s13, %s930_s17 }
   0xa   : > { %p517_p6 = scmp.ge.s32.totalorder %s684_s14, 1  ;;  %p86_p7 = scmp.eq.s32.totalorder %s83_s20, 0 }
   0xb   : > { %p753_p8 = por %p105_p5, %p104_p3  ;;  %p147_p9 = scmp.lt.s32.totalorder %s684_s14, 3 }
   0xc   : > { %s759_s22 = scalar_select %p86_p7, %s672_s11, %s88_s18  }
   0xd   : > { %p148_p10 = pnand %p517_p6, %p147_p9 }
   0xe   : > { %s762_s23 = smul.u32 (!%p148_p10), 13, %s676_s12  ;;  %s174_s29 = sand.u32 (!%p148_p10), 1, %s668_s10  }
   0xf   : > { %151 = sbr.rel (%p148_p10) target bundleno = 244 (0xf4), region = 28  ;;  %s852_s16 = scalar_lea.sflag (!%p148_p10), [#allocation3], %s174_s29 }
  0x10   : > { %p182_p11 = scmp.lt.s32.totalorder (!%p148_p10), %s762_s23, 24  ;;  %s527_s6 = smul.u32 (!%p148_p10), 104, %s174_s29 }
  0x12   : > { %s796_s15 = scalar_lea.vmem (!%p148_p10), [#allocation2], %s527_s6 }
  0x14   : > { %v686_v0 = vmov 0   ;;  %s183_s24 = scalar_select %p182_p11, %s762_s23, 24  ;;  %v687_v14 = vmov 1   ;;  %v779_v21 = vld [vmem:[%s919_s1 + $0x1] ss:$0 sm:$0xff] }
  0x15   : > { %588 = vset.pattern.permute.xlu2 %v686_v0  ;;  %587 = vset.pattern.permute.xlu1 %v686_v0  ;;  %v784_v22 = vld [vmem:[%s919_s1] ss:$0 sm:$0xff]  ;;  %v792_v27 = vld [vmem:[%s919_s1 + $0x2] ss:$0 sm:$0xff]  ;;  %s410_s18 = ssub.s32 (%p746_p4), 25, %s762_s23 }
  0x16   : > { %586 = vset.pattern.permute.xlu0 %v686_v0  ;;  %s518_s25 = sshll.u32 %s183_s24, 3  ;;  %p411_p12 = scmp.lt.s32.totalorder (%p746_p4), %s410_s18, 13 }
  0x17   : > { %s185_s28 = scalar_lea.vmem %s918_s0, %s518_s25 }
  0x18   : > { %v204_v1 = vld [vmem:[%s185_s28 + $0x20] sm:$0xff]  ;;  %v202_v2 = vld [vmem:[%s185_s28 + $0x10] sm:$0xff]  ;;  %v205_v4 = vld [vmem:[%s185_s28 + $0x28] sm:$0xff] }
  0x19   : > { %v200_v3 = vld [vmem:[%s185_s28] sm:$0xff]  ;;  %238 = vperm.xlu2 %588, %v204_v1   ;;  %228 = vperm.xlu1 %587, %v202_v2   ;;  %v203_v5 = vld [vmem:[%s185_s28 + $0x18] sm:$0xff]  ;;  %v201_v6 = vld [vmem:[%s185_s28 + $0x8] sm:$0xff] }
  0x1a   : > { %218 = vperm.xlu0 %586, %v200_v3   ;;  %v208_v7 = vld [vmem:[%s185_s28 + $0x40] sm:$0xff]  ;;  %v207_v8 = vld [vmem:[%s185_s28 + $0x38] sm:$0xff]  ;;  %v206_v9 = vld [vmem:[%s185_s28 + $0x30] sm:$0xff] }
  0x1b   : > { %v211_v10 = vld [vmem:[%s185_s28 + $0x58] sm:$0xff]  ;;  %v210_v11 = vld [vmem:[%s185_s28 + $0x50] sm:$0xff]  ;;  %v209_v12 = vld [vmem:[%s185_s28 + $0x48] sm:$0xff] }
  0x1c   : > { %v212_v13 = vld [vmem:[%s185_s28 + $0x60] sm:$0xff] }
  0x21   : > { %243 = vperm.xlu2 %588, %v205_v4   ;;  %233 = vperm.xlu1 %587, %v203_v5  }
  0x22   : > { %223 = vperm.xlu0 %586, %v201_v6  }
  0x29   : > { %258 = vperm.xlu2 %588, %v208_v7   ;;  %253 = vperm.xlu1 %587, %v207_v8  }
  0x2a   : > { %248 = vperm.xlu0 %586, %v206_v9  }
  0x31   : > { %273 = vperm.xlu2 %588, %v211_v10   ;;  %268 = vperm.xlu1 %587, %v210_v11  }
  0x32   : > { %263 = vperm.xlu0 %586, %v209_v12  }
  0x39   : > { %590 = vset.pattern.permute.xlu2 %v687_v14  ;;  %589 = vset.pattern.permute.xlu1 %v687_v14 }
  0x3a   : > { %278 = vperm.xlu0 %586, %v212_v13   ;;  %300 = vperm.xlu2 %590, %v201_v6  }
  0x3b   : > { %296 = vperm.xlu1 %589, %v200_v3  }
  0x42   : > { %591 = vset.pattern.permute.xlu0 %v687_v14  ;;  %312 = vperm.xlu2 %590, %v204_v1  }
  0x43   : > { %308 = vperm.xlu1 %589, %v203_v5   ;;  %304 = vperm.xlu0 %591, %v202_v2  }
  0x4a   : > { %320 = vperm.xlu2 %590, %v206_v9  }
  0x4b   : > { %316 = vperm.xlu1 %589, %v205_v4   ;;  %324 = vperm.xlu0 %591, %v207_v8  }
  0x52   : > { %332 = vperm.xlu2 %590, %v209_v12  }
  0x53   : > { %328 = vperm.xlu1 %589, %v208_v7   ;;  %336 = vperm.xlu0 %591, %v210_v11  }
  0x5a   : > { %344 = vperm.xlu2 %590, %v212_v13  }
  0x5b   : > { %340 = vperm.xlu1 %589, %v211_v10  }
  0x73   : > { %v239_v15 = vpop.permute.xlu2 %238 }
  0x74   : > { %v286_v34 = vmul.f32 %v784_v22, %v239_v15 }
  0x7b   : > { %v770_v16 = vpop.permute.xlu2 %243 }
  0x7c   : > { %v287_v9 = vmul.f32 %v784_v22, %v770_v16 }
  0x83   : > { %v772_v17 = vpop.permute.xlu2 %258 }
  0x84   : > { %v290_v16 = vmul.f32 %v784_v22, %v772_v17 }
  0x8b   : > { %v774_v18 = vpop.permute.xlu2 %273  ;;  %v229_v19 = vpop.permute.xlu1 %228 }
  0x8c   : > { %v219_v20 = vpop.permute.xlu0 %218  ;;  %v284_v61 = vmul.f32 %v784_v22, %v229_v19 }
  0x8d   : > { %v282_v50 = vmul.f32 %v784_v22, %v219_v20 }
  0x93   : > { %v234_v23 = vpop.permute.xlu1 %233 }
  0x94   : > { %v224_v24 = vpop.permute.xlu0 %223  ;;  %v301_v25 = vpop.permute.xlu2 %300  ;;  %v285_v62 = vmul.f32 %v784_v22, %v234_v23 }
  0x95   : > { %v283_v26 = vmul.f32 %v784_v22, %v224_v24  ;;  %v349_v28 = vmul.f32 %v779_v21, %v301_v25 }
  0x97   : > { %v362_v29 = vadd.f32 %v349_v28, %v283_v26 }
  0x99   : > { %v376_v30 = vadd.f32 %v792_v27, %v362_v29 }
  0x9b   : > { %389 = vst [vmem:[%s796_s15 + $0x8] sm:$0xff] %v376_v30  ;;  %v254_v31 = vpop.permute.xlu1 %253 }
  0x9c   : > { %v249_v32 = vpop.permute.xlu0 %248  ;;  %v313_v33 = vpop.permute.xlu2 %312  ;;  %v289_v10 = vmul.f32 %v784_v22, %v254_v31 }
  0x9d   : > { %v352_v35 = vmul.f32 %v779_v21, %v313_v33  ;;  %v288_v41 = vmul.f32 %v784_v22, %v249_v32  ;;  %v293_v33 = vmul.f32 %v784_v22, %v774_v18 }
  0x9f   : > { %v365_v36 = vadd.f32 %v352_v35, %v286_v34 }
  0xa1   : > { %v379_v37 = vadd.f32 %v792_v27, %v365_v36 }
  0xa3   : > { %392 = vst [vmem:[%s796_s15 + $0x20] sm:$0xff] %v379_v37  ;;  %v269_v38 = vpop.permute.xlu1 %268 }
  0xa4   : > { %v264_v39 = vpop.permute.xlu0 %263  ;;  %v321_v40 = vpop.permute.xlu2 %320  ;;  %v292_v24 = vmul.f32 %v784_v22, %v269_v38 }
  0xa5   : > { %v354_v42 = vmul.f32 %v779_v21, %v321_v40  ;;  %v291_v47 = vmul.f32 %v784_v22, %v264_v39 }
  0xa7   : > { %v367_v43 = vadd.f32 %v354_v42, %v288_v41 }
  0xa9   : > { %v381_v44 = vadd.f32 %v792_v27, %v367_v43 }
  0xab   : > { %394 = vst [vmem:[%s796_s15 + $0x30] sm:$0xff] %v381_v44 }
  0xac   : > { %v279_v45 = vpop.permute.xlu0 %278  ;;  %v333_v46 = vpop.permute.xlu2 %332 }
  0xad   : > { %v357_v48 = vmul.f32 %v779_v21, %v333_v46  ;;  %v297_v49 = vpop.permute.xlu1 %296  ;;  %v294_v57 = vmul.f32 %v784_v22, %v279_v45 }
  0xae   : > { %v348_v51 = vmul.f32 %v779_v21, %v297_v49 }
  0xaf   : > { %v370_v52 = vadd.f32 %v357_v48, %v291_v47 }
  0xb0   : > { %v361_v53 = vadd.f32 %v348_v51, %v282_v50 }
  0xb1   : > { %v384_v54 = vadd.f32 %v792_v27, %v370_v52 }
  0xb2   : > { %v375_v55 = vadd.f32 %v792_v27, %v361_v53 }
  0xb3   : > { %397 = vst [vmem:[%s796_s15 + $0x48] sm:$0xff] %v384_v54 }
  0xb4   : > { %388 = vst [vmem:[%s796_s15] sm:$0xff] %v375_v55  ;;  %v345_v56 = vpop.permute.xlu2 %344 }
  0xb5   : > { %v360_v58 = vmul.f32 %v779_v21, %v345_v56  ;;  %v309_v59 = vpop.permute.xlu1 %308  ;;  %v305_v60 = vpop.permute.xlu0 %304 }
  0xb6   : > { %v351_v63 = vmul.f32 %v779_v21, %v309_v59  ;;  %v350_v0 = vmul.f32 %v779_v21, %v305_v60 }
  0xb7   : > { %v373_v1 = vadd.f32 %v360_v58, %v294_v57 }
  0xb8   : > { %v364_v2 = vadd.f32 %v351_v63, %v285_v62  ;;  %v363_v3 = vadd.f32 %v350_v0, %v284_v61 }
  0xb9   : > { %v387_v4 = vadd.f32 %v792_v27, %v373_v1 }
  0xba   : > { %v378_v5 = vadd.f32 %v792_v27, %v364_v2  ;;  %v377_v6 = vadd.f32 %v792_v27, %v363_v3 }
  0xbb   : > { %400 = vst [vmem:[%s796_s15 + $0x60] sm:$0xff] %v387_v4 }
  0xbc   : > { %391 = vst [vmem:[%s796_s15 + $0x18] sm:$0xff] %v378_v5 }
  0xbd   : > { %390 = vst [vmem:[%s796_s15 + $0x10] sm:$0xff] %v377_v6  ;;  %v317_v7 = vpop.permute.xlu1 %316  ;;  %v325_v8 = vpop.permute.xlu0 %324 }
  0xbe   : > { %v353_v11 = vmul.f32 %v779_v21, %v317_v7  ;;  %v355_v12 = vmul.f32 %v779_v21, %v325_v8 }
  0xc0   : > { %v366_v13 = vadd.f32 %v353_v11, %v287_v9  ;;  %v368_v14 = vadd.f32 %v355_v12, %v289_v10 }
  0xc2   : > { %v380_v15 = vadd.f32 %v792_v27, %v366_v13  ;;  %v382_v19 = vadd.f32 %v792_v27, %v368_v14 }
  0xc4   : > { %393 = vst [vmem:[%s796_s15 + $0x28] sm:$0xff] %v380_v15 }
  0xc5   : > { %395 = vst [vmem:[%s796_s15 + $0x38] sm:$0xff] %v382_v19  ;;  %v329_v20 = vpop.permute.xlu1 %328  ;;  %v337_v23 = vpop.permute.xlu0 %336 }
  0xc6   : > { %v356_v25 = vmul.f32 %v779_v21, %v329_v20  ;;  %v358_v26 = vmul.f32 %v779_v21, %v337_v23 }
  0xc8   : > { %v369_v28 = vadd.f32 %v356_v25, %v290_v16  ;;  %v371_v29 = vadd.f32 %v358_v26, %v292_v24 }
  0xca   : > { %v383_v30 = vadd.f32 %v792_v27, %v369_v28  ;;  %v385_v31 = vadd.f32 %v792_v27, %v371_v29 }
  0xcc   : > { %396 = vst [vmem:[%s796_s15 + $0x40] sm:$0xff] %v383_v30 }
  0xcd   : > { %398 = vst [vmem:[%s796_s15 + $0x50] sm:$0xff] %v385_v31  ;;  %v341_v32 = vpop.permute.xlu1 %340 }
  0xce   : > { %v359_v17 = vmul.f32 %v779_v21, %v341_v32 }
  0xd0   : > { %v372_v34 = vadd.f32 %v359_v17, %v293_v33  ;;  %408 = sbr.rel (!%p746_p4) target bundleno = 244 (0xf4), region = 32 }
  0xd2   : > { %v386_v35 = vadd.f32 %v792_v27, %v372_v34 }
  0xd4   : > { %399 = vst [vmem:[%s796_s15 + $0x58] sm:$0xff] %v386_v35 }
  0xd5   : > { %s932_s18 = smov (!%p411_p12, %s410_s18), 13 }
  0xd6   : > { %s519_s20 = sshll.u32 %s932_s18, 3 }
  0xd7   : > { %s414_s24 = ssub.s32 104, %s519_s20 }
  0xd8   : > { %s415_s25 = sshll.u32 %s414_s24, 4 }
  0xd9   : > { %416 = vsyncadd %s852_s16, %s415_s25  ;;  %p861_p13 = scmp.ne.s32.totalorder %s519_s20, 0  ;;  %s526_s19 = smul.u32 104, %s676_s12 }
  0xda   : > { %s422_s27 = sshll.u32 %s796_s15, 4  ;;  %s523_s23 = sshll.u32 %s932_s18, 7  ;;  %s871_s27 = int_to_ptr.vmem [resolvable:$true] %s422_s27 }
  0xdb   : > { %s420_s30 = scalar_lea.hbm %s920_s2, %s526_s19  ;;  %s595_s4 = sshra.s32 %s871_s27, 4  ;;  %s596_s4 = int_to_ptr.vmem [resolvable:$true] %s595_s4 }
  0xdc   : > { %s424_s3 = sshll.u32 %s420_s30, 4  ;;  %s597_s5 = sshrl.u32 %s523_s23, 4  ;;  %s873_s3 = int_to_ptr.hbm [resolvable:$true] %s424_s3 }
  0xdd   : > { %s602_s6 = scalar_lea.vmem %s596_s4, %s597_s5  ;;  %s688_s12 = smov [#allocation2]  }
  0xde   : > { %p603_p0 = scmp.ne.s32.totalorder %s596_s4, %s602_s6  ;;  %s606_s7 = scalar_lea.vmem %s688_s12, 208 }
  0xdf   : > { %p608_p3 = scmp.lt.s32.totalorder %s606_s7, %s602_s6 }
  0xe0   : > { %p604_p1 = pnand %p603_p0, %p861_p13 }
  0xe2   : > { %p605_p2 = pneg %p604_p1 }
  0xe4   : > { %p610_p4 = pnand %p608_p3, %p605_p2 }
  0xe6   : > { %613 = shalt.err (!%p610_p4)
}
  0xe7   : > { %s614_s8 = sshra.s32 %s873_s3, 4  ;;  %s625_s25 = scalar_lea.hbm %s920_s2, 200  ;;  %s615_s8 = int_to_ptr.hbm [resolvable:$true] %s614_s8 }
  0xe8   : > { %s621_s15 = scalar_lea.hbm %s615_s8, %s597_s5  ;;  %p626_p9 = scmp.lt.s32.totalorder %s615_s8, %s920_s2 }
  0xe9   : > { %p622_p5 = scmp.ne.s32.totalorder %s615_s8, %s621_s15  ;;  %p627_p10 = scmp.lt.s32.totalorder %s625_s25, %s621_s15 }
  0xeb   : > { %p623_p6 = pnand %p622_p5, %p861_p13  ;;  %p628_p11 = por %p627_p10, %p626_p9 }
  0xed   : > { %p624_p7 = pneg %p623_p6 }
  0xef   : > { %p629_p12 = pnand %p628_p11, %p624_p7 }
  0xf1   : > { %632 = shalt.err (!%p629_p12)
}
  0xf2   : > { %s689_s29 = smov 128   ;;  %s690_s30 = smov 8  }
  0xf3   : > { %430 = dma.vmem_to_hbm [thread:$0]  (%p861_p13), %s871_s27, %s523_s23, %s873_s3, %s852_s16, %s689_s29, %s689_s29, %s690_s30  }
  0xf4 PF: > { %p533_p0 = scmp.ge.s32.totalorder %s684_s14, 2  ;;  %s439_s4 = sand.u32 1, %s664_s9  }
  0xf5   : > { %s440_s5 = scalar_lea.sflag [#allocation3], %s439_s4 }
  0xf6   : > { %p530_p1 = pnand %p533_p0, %p753_p8 }
  0xf8   : > { %p531_p2 = pneg %p530_p1 }
  0xfa   : > { %659 = dma.done.wait (%p531_p2), %s440_s5, 1664  }
  0xfb   : > { %661 = vsyncadd (%p531_p2), %s440_s5, 4294965632  ;;  %s15_s14 = sadd.s32 1, %s684_s14   ;;  %s924_s9 = smov %s668_s10 }
  0xfc   : > { %p12_p3 = scmp.ge.s32.totalorder %s15_s14, 4   ;;  %s925_s10 = smov %s672_s11 }
  0xfd   : > { %s926_s11 = smov %s759_s22  ;;  %s927_s12 = smov %s680_s13 }
  0xfe   : > { %s928_s13 = smov %s930_s17  ;;  %14 = sbr.rel (!%p12_p3) target bundleno = 4 (0x4), region = 66 }
 0x103   :  { %446 = vsyncpa [#allocation3], 1 }
 0x104   :  { %448 = vsyncpa [#allocation3 + $0x1], 1 }

</bundles_post_ra>
